<compile_context>
chip_gen: v7x
topology: tpu7x:2x2x1
jax: 0.10.0
libtpu: 0.0.40
codegen_flags: <defaults>
</compile_context>

<pallas_src>
import functools
import math

import jax
import jax.numpy as jnp
import numpy as np
from jax import lax
from jax.experimental import pallas as pl
from jax.experimental.pallas import tpu as pltpu


def _unpack_kernel(offs_ref, bsz_ref,           # scalar prefetch (SMEM): per-step row offset / batch size
                   data_ref,                     # packed rows in HBM (pl.ANY)
                   out_ref,                      # (B, tt*F) VMEM output block
                   buf0, buf1, sem,              # scratch: two (copy_rows+B, F) VMEM chunk buffers, 2 DMA sems
                   *, batch, feat, total_rows, tile_steps, chunk_steps, n_chunks,
                   group_steps, copy_rows, t_valid, guard_tail, padding_value):
    base = pl.program_id(0) * tile_steps
    bufs = (buf0, buf1)
    src_max = total_rows - copy_rows             # static, >= 0

    def chunk_dma(start_off, buf, slot):
        # One contiguous, fixed-size DMA covering all packed rows of the chunk; the start is
        # clamped so the window always stays inside the packed data (no tail padding needed).
        src0 = jnp.minimum(start_off, src_max)
        return pltpu.make_async_copy(data_ref.at[pl.ds(src0, copy_rows), :],
                                     buf.at[:copy_rows, :], sem.at[slot])

    # Prime the pipeline: chunk 0 of every tile contains at least one valid time step.
    chunk_dma(offs_ref[base], buf0, 0).start()

    # Hoisted once per tile (JAX does not CSE broadcasts).
    row_ids = lax.broadcasted_iota(jnp.int32, (batch, 1), 0)
    pad_val = jnp.asarray(padding_value, dtype=out_ref.dtype)

    for c in range(n_chunks):                    # static unroll: buffer slot / lane offsets stay static
        slot = c & 1
        buf = bufs[slot]
        step0 = base + c * chunk_steps

        # ---- all SMEM scalar reads happen BEFORE the DMA wait (wait breaks sst->sld fwd) ----
        off0 = offs_ref[step0]
        src0 = jnp.minimum(off0, src_max)
        locs = [offs_ref[step0 + k] - src0 for k in range(chunk_steps)]
        bss = [bsz_ref[step0 + k] for k in range(chunk_steps)]
        nxt = None
        if c + 1 < n_chunks:
            nxt = chunk_dma(offs_ref[step0 + chunk_steps], bufs[1 - slot], 1 - slot)

        cur = pltpu.make_async_copy(data_ref.at[pl.ds(src0, copy_rows), :],
                                    buf.at[:copy_rows, :], sem.at[slot])
        skippable = guard_tail and c > 0         # only trailing chunks of the last tile can be empty
        if skippable:
            @pl.when(step0 < t_valid)
            def _wait():
                cur.wait()
        else:
            cur.wait()

        # Prefetch the next chunk while this one is masked and stored.
        if nxt is not None:
            if guard_tail:
                @pl.when(step0 + chunk_steps < t_valid)
                def _start():
                    nxt.start()
            else:
                nxt.start()

        def emit_chunk(buf=buf, locs=locs, bss=bss, c=c):
            # Group `group_steps` consecutive steps into one 128-lane-aligned, lane-dense store.
            s = 0
            while s < chunk_steps:
                gsz = min(group_steps, chunk_steps - s)
                pieces = []
                for k in range(s, s + gsz):
                    win = buf[pl.ds(locs[k], batch), :]
                    pieces.append(jnp.where(row_ids < bss[k], win, pad_val).astype(out_ref.dtype))
                vals = pieces[0] if gsz == 1 else jnp.concatenate(pieces, axis=-1)
                col0 = (c * chunk_steps + s) * feat
                out_ref[:, col0:col0 + gsz * feat] = vals
                s += gsz

        if skippable:
            @pl.when(step0 < t_valid)
            def _emit():
                emit_chunk()
        else:
            emit_chunk()


def sequence_unpacker(data, batch_sizes, sizes, padding_value=0.0,
                      tile_steps=None, out_block_target_bytes=4 << 20):
    """pad_packed_sequence(batch_first=True) on a (data, batch_sizes) PackedSequence.

    data:        (sum(batch_sizes), F) packed values, time-major (descending-length sort).
    batch_sizes: (T,) number of active sequences per time step (non-increasing).
    sizes:       (B,) original sequence lengths (returned untouched, like the module).
    Returns (out, sizes) with out of shape (B, T, F), padded with padding_value.
    """
    total, feat = data.shape
    T = int(batch_sizes.shape[0])
    B = int(sizes.shape[0])
    assert T >= 1 and B >= 1 and total >= B
    dtype = data.dtype
    itemsize = jnp.dtype(dtype).itemsize

    # PackedSequence invariants (checked when batch_sizes is concrete).
    try:
        bs_host = np.asarray(batch_sizes, dtype=np.int64)
        assert int(bs_host.max()) <= B and int(bs_host[0]) == B
        assert np.all(np.diff(bs_host) <= 0), "batch_sizes must be non-increasing"
        assert int(bs_host.sum()) == total
    except (jax.errors.TracerArrayConversionError, jax.errors.ConcretizationTypeError):
        pass

    # ---- tile / chunk geometry -------------------------------------------------------------
    g = 128 // math.gcd(feat, 128)        # steps per 128-lane-aligned store group
    row_bytes = B * feat * itemsize       # bytes of one output time step
    max_tile_steps = 32                   # bound on the statically unrolled per-step code
    ng_pref = min(16,
                  max(1, max_tile_steps // g),
                  max(1, out_block_target_bytes // max(1, g * row_bytes)),
                  max(1, (((T + 1) // 2) + g - 1) // g))   # keep >=2 tiles when T allows (v7x megacore)

    if tile_steps is not None:
        tt = min(int(tile_steps), T)
        if tt < T:
            tt = max(g, (tt // g) * g)
    elif T <= ng_pref * g:
        tt = T                            # single full-extent block (always legal)
    else:
        tt = ng_pref * g                  # default: padded final tile + cheap wrapper slice
        for ng in range(ng_pref, (ng_pref - 1) // 2, -1):
            if T % (ng * g) == 0:         # prefer an exact divisor: no partial block, no slice copy
                tt = ng * g
                break

    num_tiles = -(-T // tt)
    t_pad = num_tiles * tt
    n_chunks = 2 if (tt % (2 * g) == 0 and tt >= 2 * g) else 1
    cs = tt // n_chunks                   # time steps per input DMA chunk
    copy_rows = min(cs * B, total)        # packed rows fetched per chunk (fixed-size DMA)
    buf_rows = copy_rows + B              # + B slack rows: every per-step window read stays in VMEM
    guard_tail = (n_chunks > 1) and (t_pad - T) >= cs

    # ---- scalar prefetch tables (SMEM) -------------------------------------------------------
    bsz = jnp.asarray(batch_sizes).astype(jnp.int32)
    if t_pad > T:
        bsz = jnp.concatenate([bsz, jnp.zeros((t_pad - T,), jnp.int32)])
    offs = jnp.concatenate([jnp.zeros((1,), jnp.int32),
                            jnp.cumsum(bsz, dtype=jnp.int32)[:-1]])

    kernel = functools.partial(
        _unpack_kernel, batch=B, feat=feat, total_rows=total, tile_steps=tt,
        chunk_steps=cs, n_chunks=n_chunks, group_steps=g, copy_rows=copy_rows,
        t_valid=T, guard_tail=guard_tail, padding_value=padding_value)

    out_block_bytes = B * tt * feat * itemsize
    chunk_bytes = buf_rows * feat * itemsize
    vmem_limit = int(min(48 << 20, max(16 << 20, 4 * out_block_bytes + 4 * chunk_bytes)))

    out_flat = pl.pallas_call(
        kernel,
        out_shape=jax.ShapeDtypeStruct((B, t_pad * feat), dtype),
        grid_spec=pltpu.PrefetchScalarGridSpec(
            num_scalar_prefetch=2,                          # offsets, batch_sizes -> SMEM
            grid=(num_tiles,),
            in_specs=[pl.BlockSpec(memory_space=pl.ANY)],   # packed data stays in HBM
            out_specs=pl.BlockSpec((B, tt * feat), lambda i, *_: (0, i)),
            scratch_shapes=[pltpu.VMEM((buf_rows, feat), dtype),
                            pltpu.VMEM((buf_rows, feat), dtype),
                            pltpu.SemaphoreType.DMA((2,))],
        ),
        compiler_params=pltpu.CompilerParams(
            dimension_semantics=("parallel",),              # tiles are self-contained
            vmem_limit_bytes=vmem_limit,
        ),
    )(offs, bsz, data)

    out = out_flat if t_pad == T else out_flat[:, :T * feat]
    return out.reshape(B, T, feat), sizes


def _reference_unpack(data, batch_sizes, lengths, padding_value=0.0):
    data = np.asarray(data)
    batch_sizes = np.asarray(batch_sizes)
    T = int(batch_sizes.shape[0])
    B = int(lengths.shape[0])
    F = data.shape[1]
    out = np.full((B, T, F), padding_value, dtype=data.dtype)
    off = 0
    for t in range(T):
        bs = int(batch_sizes[t])
        out[:bs, t, :] = data[off:off + bs]
        off += bs
    return out


def _run_case(key, lengths, feat, padding_value, tile_steps=None):
    lengths = np.asarray(lengths, dtype=np.int32)
    T = int(lengths.max())
    batch_sizes_np = np.array([(lengths > t).sum() for t in range(T)], dtype=np.int32)
    total = int(batch_sizes_np.sum())

    data = jax.random.normal(key, (total, feat), dtype=jnp.float32)
    out, sizes_out = sequence_unpacker(data, jnp.asarray(batch_sizes_np), jnp.asarray(lengths),
                                       padding_value=padding_value, tile_steps=tile_steps)
    out = jax.block_until_ready(out)

    ref = _reference_unpack(np.asarray(data), batch_sizes_np, lengths, padding_value)
    np.testing.assert_allclose(np.asarray(out), ref, rtol=0, atol=0)
    assert out.shape == (lengths.shape[0], T, feat)
    assert np.array_equal(np.asarray(sizes_out), lengths)


if __name__ == "__main__":
    key = jax.random.PRNGKey(0)
    k1, k2, k3 = jax.random.split(key, 3)

    # Case 1: F=32 (g=4), T=16 -> exact-divisor tiles (tt=8, 2 tiles, 2 chunks/tile), clamped
    # tail DMA windows, 128-lane grouped stores.
    _run_case(k1, [16, 11, 5, 2], feat=32, padding_value=0.0)

    # Case 2: F=256 (g=1), T=7 (prime) -> padded final tile + wrapper slice, partially padded
    # last tile, non-zero padding value, odd batch size.
    _run_case(k2, [7, 4, 2], feat=256, padding_value=-1.5)

    # Case 3: F=32, T=11 -> the last tile's second chunk is entirely padding and its DMA/stores
    # are skipped via pl.when; B=5 not a multiple of 8.
    _run_case(k3, [11, 9, 4, 4, 2], feat=32, padding_value=2.25)

    print("KERNEL_OK")
</pallas_src>

<mosaic_0001>
module attributes {stable_mosaic.version = 11 : i64} {
  func.func @_unpack_kernel(%arg0: i32, %arg1: memref<16xi32, #tpu.memory_space<smem>>, %arg2: memref<16xi32, #tpu.memory_space<smem>>, %arg3: memref<34x32xf32, #tpu.memory_space<any>>, %arg4: memref<4x256xf32, #tpu.memory_space<vmem>>, %arg5: memref<20x32xf32, #tpu.memory_space<vmem>>, %arg6: memref<20x32xf32, #tpu.memory_space<vmem>>, %arg7: memref<2x!tpu.dma_semaphore, #tpu.memory_space<semaphore_mem>>) attributes {dimension_semantics = [#tpu.dimension_semantics<parallel>], iteration_bounds = array<i64: 2>, scalar_prefetch = 2 : i64, scratch_operands = 3 : i64, tpu.core_type = #tpu.core_type<tc>, window_params = [{}, {transform_indices = @transform_1, window_bounds = array<i64: 4, 256>}]} {
    %c8_i32 = arith.constant 8 : i32
    %0 = arith.muli %arg0, %c8_i32 : i32
    %1 = arith.index_cast %0 : i32 to index
    %2 = memref.load %arg1[%1] : memref<16xi32, #tpu.memory_space<smem>>
    %c18_i32 = arith.constant 18 : i32
    %3 = arith.minsi %2, %c18_i32 : i32
    %c0_i32 = arith.constant 0 : i32
    %c0_i32_0 = arith.constant 0 : i32
    %4 = tpu.memref_slice %arg3[%3, %c0_i32_0] : memref<34x32xf32, #tpu.memory_space<any>> -> memref<16x32xf32, #tpu.memory_space<any>>
    %c0_i32_1 = arith.constant 0 : i32
    %c0_i32_2 = arith.constant 0 : i32
    %5 = tpu.memref_slice %arg5[%c0_i32_1, %c0_i32_2] : memref<20x32xf32, #tpu.memory_space<vmem>> -> memref<16x32xf32, #tpu.memory_space<vmem>>
    %6 = tpu.memref_slice %arg7[%c0_i32] : memref<2x!tpu.dma_semaphore, #tpu.memory_space<semaphore_mem>> -> memref<1x!tpu.dma_semaphore, #tpu.memory_space<semaphore_mem>>
    %7 = tpu.memref_squeeze %6 : memref<1x!tpu.dma_semaphore, #tpu.memory_space<semaphore_mem>> -> memref<!tpu.dma_semaphore, #tpu.memory_space<semaphore_mem>>
    tpu.enqueue_dma source(%4 : memref<16x32xf32, #tpu.memory_space<any>>) target(%5 : memref<16x32xf32, #tpu.memory_space<vmem>>) target_semaphore(%7 : memref<!tpu.dma_semaphore, #tpu.memory_space<semaphore_mem>>)
    %8 = tpu.iota {dimensions = array<i32: 0>} : vector<4x1xi32>
    %c0_i32_3 = arith.constant 0 : i32
    %9 = arith.addi %0, %c0_i32_3 : i32
    %10 = arith.index_cast %9 : i32 to index
    %11 = memref.load %arg1[%10] : memref<16xi32, #tpu.memory_space<smem>>
    %c18_i32_4 = arith.constant 18 : i32
    %12 = arith.minsi %11, %c18_i32_4 : i32
    %c0_i32_5 = arith.constant 0 : i32
    %13 = arith.addi %9, %c0_i32_5 : i32
    %14 = arith.index_cast %13 : i32 to index
    %15 = memref.load %arg1[%14] : memref<16xi32, #tpu.memory_space<smem>>
    %16 = arith.subi %15, %12 : i32
    %c1_i32 = arith.constant 1 : i32
    %17 = arith.addi %9, %c1_i32 : i32
    %18 = arith.index_cast %17 : i32 to index
    %19 = memref.load %arg1[%18] : memref<16xi32, #tpu.memory_space<smem>>
    %20 = arith.subi %19, %12 : i32
    %c2_i32 = arith.constant 2 : i32
    %21 = arith.addi %9, %c2_i32 : i32
    %22 = arith.index_cast %21 : i32 to index
    %23 = memref.load %arg1[%22] : memref<16xi32, #tpu.memory_space<smem>>
    %24 = arith.subi %23, %12 : i32
    %c3_i32 = arith.constant 3 : i32
    %25 = arith.addi %9, %c3_i32 : i32
    %26 = arith.index_cast %25 : i32 to index
    %27 = memref.load %arg1[%26] : memref<16xi32, #tpu.memory_space<smem>>
    %28 = arith.subi %27, %12 : i32
    %c0_i32_6 = arith.constant 0 : i32
    %29 = arith.addi %9, %c0_i32_6 : i32
    %30 = arith.index_cast %29 : i32 to index
    %31 = memref.load %arg2[%30] : memref<16xi32, #tpu.memory_space<smem>>
    %c1_i32_7 = arith.constant 1 : i32
    %32 = arith.addi %9, %c1_i32_7 : i32
    %33 = arith.index_cast %32 : i32 to index
    %34 = memref.load %arg2[%33] : memref<16xi32, #tpu.memory_space<smem>>
    %c2_i32_8 = arith.constant 2 : i32
    %35 = arith.addi %9, %c2_i32_8 : i32
    %36 = arith.index_cast %35 : i32 to index
    %37 = memref.load %arg2[%36] : memref<16xi32, #tpu.memory_space<smem>>
    %c3_i32_9 = arith.constant 3 : i32
    %38 = arith.addi %9, %c3_i32_9 : i32
    %39 = arith.index_cast %38 : i32 to index
    %40 = memref.load %arg2[%39] : memref<16xi32, #tpu.memory_space<smem>>
    %c4_i32 = arith.constant 4 : i32
    %41 = arith.addi %9, %c4_i32 : i32
    %42 = arith.index_cast %41 : i32 to index
    %43 = memref.load %arg1[%42] : memref<16xi32, #tpu.memory_space<smem>>
    %c18_i32_10 = arith.constant 18 : i32
    %44 = arith.minsi %43, %c18_i32_10 : i32
    %c0_i32_11 = arith.constant 0 : i32
    %c0_i32_12 = arith.constant 0 : i32
    %45 = tpu.memref_slice %arg3[%12, %c0_i32_12] : memref<34x32xf32, #tpu.memory_space<any>> -> memref<16x32xf32, #tpu.memory_space<any>>
    %c0_i32_13 = arith.constant 0 : i32
    %c0_i32_14 = arith.constant 0 : i32
    %46 = tpu.memref_slice %arg5[%c0_i32_13, %c0_i32_14] : memref<20x32xf32, #tpu.memory_space<vmem>> -> memref<16x32xf32, #tpu.memory_space<vmem>>
    %47 = tpu.memref_slice %arg7[%c0_i32_11] : memref<2x!tpu.dma_semaphore, #tpu.memory_space<semaphore_mem>> -> memref<1x!tpu.dma_semaphore, #tpu.memory_space<semaphore_mem>>
    %48 = tpu.memref_squeeze %47 : memref<1x!tpu.dma_semaphore, #tpu.memory_space<semaphore_mem>> -> memref<!tpu.dma_semaphore, #tpu.memory_space<semaphore_mem>>
    tpu.wait_dma2 semaphore(%48 : memref<!tpu.dma_semaphore, #tpu.memory_space<semaphore_mem>>) src(%45 : memref<16x32xf32, #tpu.memory_space<any>>) dst(%46 : memref<16x32xf32, #tpu.memory_space<vmem>>)
    %c1_i32_15 = arith.constant 1 : i32
    %c0_i32_16 = arith.constant 0 : i32
    %49 = tpu.memref_slice %arg3[%44, %c0_i32_16] : memref<34x32xf32, #tpu.memory_space<any>> -> memref<16x32xf32, #tpu.memory_space<any>>
    %c0_i32_17 = arith.constant 0 : i32
    %c0_i32_18 = arith.constant 0 : i32
    %50 = tpu.memref_slice %arg6[%c0_i32_17, %c0_i32_18] : memref<20x32xf32, #tpu.memory_space<vmem>> -> memref<16x32xf32, #tpu.memory_space<vmem>>
    %51 = tpu.memref_slice %arg7[%c1_i32_15] : memref<2x!tpu.dma_semaphore, #tpu.memory_space<semaphore_mem>> -> memref<1x!tpu.dma_semaphore, #tpu.memory_space<semaphore_mem>>
    %52 = tpu.memref_squeeze %51 : memref<1x!tpu.dma_semaphore, #tpu.memory_space<semaphore_mem>> -> memref<!tpu.dma_semaphore, #tpu.memory_space<semaphore_mem>>
    tpu.enqueue_dma source(%49 : memref<16x32xf32, #tpu.memory_space<any>>) target(%50 : memref<16x32xf32, #tpu.memory_space<vmem>>) target_semaphore(%52 : memref<!tpu.dma_semaphore, #tpu.memory_space<semaphore_mem>>)
    %53 = arith.index_cast %16 : i32 to index
    %c0 = arith.constant 0 : index
    %54 = vector.load %arg5[%53, %c0] : memref<20x32xf32, #tpu.memory_space<vmem>>, vector<4x32xf32>
    %55 = vector.broadcast %31 : i32 to vector<4x1xi32>
    %56 = arith.cmpi slt, %8, %55 : vector<4x1xi32>
    %cst = arith.constant 0.000000e+00 : f32
    %57 = vector.shape_cast %56 : vector<4x1xi1> to vector<4x1xi1>
    %58 = vector.broadcast %57 : vector<4x1xi1> to vector<4x32xi1>
    %59 = vector.broadcast %cst : f32 to vector<4x32xf32>
    %60 = arith.select %58, %54, %59 : vector<4x32xi1>, vector<4x32xf32>
    %61 = arith.index_cast %20 : i32 to index
    %c0_19 = arith.constant 0 : index
    %62 = vector.load %arg5[%61, %c0_19] : memref<20x32xf32, #tpu.memory_space<vmem>>, vector<4x32xf32>
    %63 = vector.broadcast %34 : i32 to vector<4x1xi32>
    %64 = arith.cmpi slt, %8, %63 : vector<4x1xi32>
    %cst_20 = arith.constant 0.000000e+00 : f32
    %65 = vector.shape_cast %64 : vector<4x1xi1> to vector<4x1xi1>
    %66 = vector.broadcast %65 : vector<4x1xi1> to vector<4x32xi1>
    %67 = vector.broadcast %cst_20 : f32 to vector<4x32xf32>
    %68 = arith.select %66, %62, %67 : vector<4x32xi1>, vector<4x32xf32>
    %69 = arith.index_cast %24 : i32 to index
    %c0_21 = arith.constant 0 : index
    %70 = vector.load %arg5[%69, %c0_21] : memref<20x32xf32, #tpu.memory_space<vmem>>, vector<4x32xf32>
    %71 = vector.broadcast %37 : i32 to vector<4x1xi32>
    %72 = arith.cmpi slt, %8, %71 : vector<4x1xi32>
    %cst_22 = arith.constant 0.000000e+00 : f32
    %73 = vector.shape_cast %72 : vector<4x1xi1> to vector<4x1xi1>
    %74 = vector.broadcast %73 : vector<4x1xi1> to vector<4x32xi1>
    %75 = vector.broadcast %cst_22 : f32 to vector<4x32xf32>
    %76 = arith.select %74, %70, %75 : vector<4x32xi1>, vector<4x32xf32>
    %77 = arith.index_cast %28 : i32 to index
    %c0_23 = arith.constant 0 : index
    %78 = vector.load %arg5[%77, %c0_23] : memref<20x32xf32, #tpu.memory_space<vmem>>, vector<4x32xf32>
    %79 = vector.broadcast %40 : i32 to vector<4x1xi32>
    %80 = arith.cmpi slt, %8, %79 : vector<4x1xi32>
    %cst_24 = arith.constant 0.000000e+00 : f32
    %81 = vector.shape_cast %80 : vector<4x1xi1> to vector<4x1xi1>
    %82 = vector.broadcast %81 : vector<4x1xi1> to vector<4x32xi1>
    %83 = vector.broadcast %cst_24 : f32 to vector<4x32xf32>
    %84 = arith.select %82, %78, %83 : vector<4x32xi1>, vector<4x32xf32>
    %85 = tpu.concatenate %60, %68, %76, %84 in 1 : vector<4x32xf32>, vector<4x32xf32>, vector<4x32xf32>, vector<4x32xf32> -> vector<4x128xf32>
    %c0_25 = arith.constant 0 : index
    %c0_26 = arith.constant 0 : index
    %86 = vector.load %arg4[%c0_25, %c0_26] : memref<4x256xf32, #tpu.memory_space<vmem>>, vector<4x128xf32>
    tpu.vector_store %arg4[%c0_25, %c0_26], %85 {strides = array<i32>} : memref<4x256xf32, #tpu.memory_space<vmem>>, vector<4x128xf32>,
    %c4_i32_27 = arith.constant 4 : i32
    %87 = arith.addi %0, %c4_i32_27 : i32
    %88 = arith.index_cast %87 : i32 to index
    %89 = memref.load %arg1[%88] : memref<16xi32, #tpu.memory_space<smem>>
    %c18_i32_28 = arith.constant 18 : i32
    %90 = arith.minsi %89, %c18_i32_28 : i32
    %c0_i32_29 = arith.constant 0 : i32
    %91 = arith.addi %87, %c0_i32_29 : i32
    %92 = arith.index_cast %91 : i32 to index
    %93 = memref.load %arg1[%92] : memref<16xi32, #tpu.memory_space<smem>>
    %94 = arith.subi %93, %90 : i32
    %c1_i32_30 = arith.constant 1 : i32
    %95 = arith.addi %87, %c1_i32_30 : i32
    %96 = arith.index_cast %95 : i32 to index
    %97 = memref.load %arg1[%96] : memref<16xi32, #tpu.memory_space<smem>>
    %98 = arith.subi %97, %90 : i32
    %c2_i32_31 = arith.constant 2 : i32
    %99 = arith.addi %87, %c2_i32_31 : i32
    %100 = arith.index_cast %99 : i32 to index
    %101 = memref.load %arg1[%100] : memref<16xi32, #tpu.memory_space<smem>>
    %102 = arith.subi %101, %90 : i32
    %c3_i32_32 = arith.constant 3 : i32
    %103 = arith.addi %87, %c3_i32_32 : i32
    %104 = arith.index_cast %103 : i32 to index
    %105 = memref.load %arg1[%104] : memref<16xi32, #tpu.memory_space<smem>>
    %106 = arith.subi %105, %90 : i32
    %c0_i32_33 = arith.constant 0 : i32
    %107 = arith.addi %87, %c0_i32_33 : i32
    %108 = arith.index_cast %107 : i32 to index
    %109 = memref.load %arg2[%108] : memref<16xi32, #tpu.memory_space<smem>>
    %c1_i32_34 = arith.constant 1 : i32
    %110 = arith.addi %87, %c1_i32_34 : i32
    %111 = arith.index_cast %110 : i32 to index
    %112 = memref.load %arg2[%111] : memref<16xi32, #tpu.memory_space<smem>>
    %c2_i32_35 = arith.constant 2 : i32
    %113 = arith.addi %87, %c2_i32_35 : i32
    %114 = arith.index_cast %113 : i32 to index
    %115 = memref.load %arg2[%114] : memref<16xi32, #tpu.memory_space<smem>>
    %c3_i32_36 = arith.constant 3 : i32
    %116 = arith.addi %87, %c3_i32_36 : i32
    %117 = arith.index_cast %116 : i32 to index
    %118 = memref.load %arg2[%117] : memref<16xi32, #tpu.memory_space<smem>>
    %c1_i32_37 = arith.constant 1 : i32
    %c0_i32_38 = arith.constant 0 : i32
    %119 = tpu.memref_slice %arg3[%90, %c0_i32_38] : memref<34x32xf32, #tpu.memory_space<any>> -> memref<16x32xf32, #tpu.memory_space<any>>
    %c0_i32_39 = arith.constant 0 : i32
    %c0_i32_40 = arith.constant 0 : i32
    %120 = tpu.memref_slice %arg6[%c0_i32_39, %c0_i32_40] : memref<20x32xf32, #tpu.memory_space<vmem>> -> memref<16x32xf32, #tpu.memory_space<vmem>>
    %121 = tpu.memref_slice %arg7[%c1_i32_37] : memref<2x!tpu.dma_semaphore, #tpu.memory_space<semaphore_mem>> -> memref<1x!tpu.dma_semaphore, #tpu.memory_space<semaphore_mem>>
    %122 = tpu.memref_squeeze %121 : memref<1x!tpu.dma_semaphore, #tpu.memory_space<semaphore_mem>> -> memref<!tpu.dma_semaphore, #tpu.memory_space<semaphore_mem>>
    tpu.wait_dma2 semaphore(%122 : memref<!tpu.dma_semaphore, #tpu.memory_space<semaphore_mem>>) src(%119 : memref<16x32xf32, #tpu.memory_space<any>>) dst(%120 : memref<16x32xf32, #tpu.memory_space<vmem>>)
    %123 = arith.index_cast %94 : i32 to index
    %c0_41 = arith.constant 0 : index
    %124 = vector.load %arg6[%123, %c0_41] : memref<20x32xf32, #tpu.memory_space<vmem>>, vector<4x32xf32>
    %125 = vector.broadcast %109 : i32 to vector<4x1xi32>
    %126 = arith.cmpi slt, %8, %125 : vector<4x1xi32>
    %cst_42 = arith.constant 0.000000e+00 : f32
    %127 = vector.shape_cast %126 : vector<4x1xi1> to vector<4x1xi1>
    %128 = vector.broadcast %127 : vector<4x1xi1> to vector<4x32xi1>
    %129 = vector.broadcast %cst_42 : f32 to vector<4x32xf32>
    %130 = arith.select %128, %124, %129 : vector<4x32xi1>, vector<4x32xf32>
    %131 = arith.index_cast %98 : i32 to index
    %c0_43 = arith.constant 0 : index
    %132 = vector.load %arg6[%131, %c0_43] : memref<20x32xf32, #tpu.memory_space<vmem>>, vector<4x32xf32>
    %133 = vector.broadcast %112 : i32 to vector<4x1xi32>
    %134 = arith.cmpi slt, %8, %133 : vector<4x1xi32>
    %cst_44 = arith.constant 0.000000e+00 : f32
    %135 = vector.shape_cast %134 : vector<4x1xi1> to vector<4x1xi1>
    %136 = vector.broadcast %135 : vector<4x1xi1> to vector<4x32xi1>
    %137 = vector.broadcast %cst_44 : f32 to vector<4x32xf32>
    %138 = arith.select %136, %132, %137 : vector<4x32xi1>, vector<4x32xf32>
    %139 = arith.index_cast %102 : i32 to index
    %c0_45 = arith.constant 0 : index
    %140 = vector.load %arg6[%139, %c0_45] : memref<20x32xf32, #tpu.memory_space<vmem>>, vector<4x32xf32>
    %141 = vector.broadcast %115 : i32 to vector<4x1xi32>
    %142 = arith.cmpi slt, %8, %141 : vector<4x1xi32>
    %cst_46 = arith.constant 0.000000e+00 : f32
    %143 = vector.shape_cast %142 : vector<4x1xi1> to vector<4x1xi1>
    %144 = vector.broadcast %143 : vector<4x1xi1> to vector<4x32xi1>
    %145 = vector.broadcast %cst_46 : f32 to vector<4x32xf32>
    %146 = arith.select %144, %140, %145 : vector<4x32xi1>, vector<4x32xf32>
    %147 = arith.index_cast %106 : i32 to index
    %c0_47 = arith.constant 0 : index
    %148 = vector.load %arg6[%147, %c0_47] : memref<20x32xf32, #tpu.memory_space<vmem>>, vector<4x32xf32>
    %149 = vector.broadcast %118 : i32 to vector<4x1xi32>
    %150 = arith.cmpi slt, %8, %149 : vector<4x1xi32>
    %cst_48 = arith.constant 0.000000e+00 : f32
    %151 = vector.shape_cast %150 : vector<4x1xi1> to vector<4x1xi1>
    %152 = vector.broadcast %151 : vector<4x1xi1> to vector<4x32xi1>
    %153 = vector.broadcast %cst_48 : f32 to vector<4x32xf32>
    %154 = arith.select %152, %148, %153 : vector<4x32xi1>, vector<4x32xf32>
    %155 = tpu.concatenate %130, %138, %146, %154 in 1 : vector<4x32xf32>, vector<4x32xf32>, vector<4x32xf32>, vector<4x32xf32> -> vector<4x128xf32>
    %c0_49 = arith.constant 0 : index
    %c128 = arith.constant 128 : index
    %156 = vector.load %arg4[%c0_49, %c128] : memref<4x256xf32, #tpu.memory_space<vmem>>, vector<4x128xf32>
    tpu.vector_store %arg4[%c0_49, %c128], %155 {strides = array<i32>} : memref<4x256xf32, #tpu.memory_space<vmem>>, vector<4x128xf32>,
    return
  }
  func.func @transform_1(%arg0: i32, %arg1: memref<16xi32, #tpu.memory_space<smem>>, %arg2: memref<16xi32, #tpu.memory_space<smem>>) -> (i32, i32) {
    %c0_i32 = arith.constant 0 : i32
    %c0_i32_0 = arith.constant 0 : i32
    return %c0_i32, %arg0 : i32, i32
  }
}

</mosaic_0001>

<bundles_post_ra>
// kernel: tpu_custom_call.1
= control target key start
LH: loop header
LB: loop body
LE: loop exit
PB: predicated region body
PF: predicated region fallthrough
CT: control target
= control target key end

     0   :  { %s752_s0 = inlined_call_operand.vmem [shape: s32[16], index: 0, kind: input, shape index: {}]   ;;  %s753_s2 = inlined_call_operand.vmem [shape: f32[34,32], index: 2, kind: input, shape index: {}]   ;;  %s754_s3 = inlined_call_operand.hbm [shape: f32[4,512], index: 3, kind: output, shape index: {}]   ;;  %s755_s1 = inlined_call_operand.vmem [shape: s32[16], index: 1, kind: input, shape index: {}]  }
   0x1   :  { %s8_s14 = sshll.u32 %s752_s0, 4  ;;  %s12_s17 = sshll.u32 %s755_s1, 4  ;;  %s9_s14 = int_to_ptr.vmem [resolvable:$true] %s8_s14  ;;  %s13_s17 = int_to_ptr.vmem [resolvable:$true] %s12_s17 }
   0x2   :  { %s437_s18 = scalar_lea.vmem %s9_s14, 16  ;;  %p442_p1 = scmp.lt.s32.totalorder %s9_s14, %s9_s14 }
   0x3   :  { %p438_p0 = scmp.ne.s32.totalorder %s9_s14, %s437_s18  ;;  %p443_p2 = scmp.lt.s32.totalorder %s437_s18, %s437_s18 }
   0x5   :  { %p444_p3 = por %p443_p2, %p442_p1 }
   0x7   :  { %p445_p4 = pnand %p444_p3, %p438_p0 }
   0x9   :  { %448 = shalt.err (!%p445_p4)  }
   0xa   :  { %s523_s19 = smov [#allocation6]   ;;  %s449_s20 = scalar_lea.vmem %s13_s17, 16 }
   0xb   :  { %11 = dma.vmem_to_smem %s9_s14, 16, %s523_s19, [#allocation5] }
   0xc   :  { %p450_p5 = scmp.ne.s32.totalorder %s13_s17, %s449_s20  ;;  %p454_p6 = scmp.lt.s32.totalorder %s13_s17, %s13_s17 }
   0xd   :  { %p455_p7 = scmp.lt.s32.totalorder %s449_s20, %s449_s20 }
   0xf   :  { %p456_p8 = por %p455_p7, %p454_p6 }
  0x11   :  { %p457_p9 = pnand %p456_p8, %p450_p5 }
  0x13   :  { %460 = shalt.err (!%p457_p9)  }
  0x14   :  { %s524_s0 = smov [#allocation7]  }
  0x15   :  { %15 = dma.vmem_to_smem %s13_s17, 16, %s524_s0, [#allocation5] }
  0x16   :  { %501 = dma.done.wait [#allocation5], 32 }
  0x17   :  { %502 = vsyncadd [#allocation5], 4294967264 }
  0x18   :  { %17 = sfence }
  0x19   :  { %18 = vsyncpa [#allocation9], 0 }
  0x1a   :  { %20 = vsyncpa [#allocation9 + $0x1], 0  ;;  %s555_s1 = smov 0   ;;  %s557_s21 = smov 0  }
  0x1b   :  { %s559_s22 = smov 0  }
  0x1c LB: > { %s388_s23 = sadd.s32 4294967295, %s521_s22   ;;  %s572_s24 = sadd.s32 1, %s521_s22   ;;  %s521_s22 = sphi %s559_s22, %s770_s22   ;;  %s517_s21 = sphi %s557_s21, %s769_s21   ;;  %s513_s1 = sphi %s555_s1, %s768_s1  }
  0x1d   : > { %s29_s25 = ssub.s32 %s521_s22, %s572_s24  ;;  %s32_s26 = sadd.s32 1, %s517_s21 }
  0x1e   : > { %p30_p10 = scmp.eq.s32.totalorder %s29_s25, 0  ;;  %p389_p11 = scmp.ne.s32.totalorder %s29_s25, 0 }
  0x1f   : > { %p36_p12 = scmp.eq.s32.totalorder %s521_s22, 1  ;;  %p41_p13 = scmp.ne.s32.totalorder %s517_s21, %s513_s1 }
  0x20   : > { %s581_s27 = scalar_select %p30_p10, %s517_s21, %s32_s26  }
  0x21   : > { %p583_p0 = por %p389_p11, %p36_p12  ;;  %p42_p1 = scmp.eq.s32.totalorder %s388_s23, 1 }
  0x22   : > { %p390_p3 = scmp.ge.s32.totalorder %s521_s22, 2 }
  0x23   : > { %p587_p2 = por %p42_p1, %p41_p13  ;;  %s756_s30 = sand.u32 (!%p390_p3), 1, %s517_s21  }
  0x24   : > { %51 = sbr.rel (%p390_p3) target bundleno = 334 (0x14e), region = 12  ;;  %s594_s4 = sshll.u32 (!%p390_p3), %s521_s22, 3 }
  0x25   : > { %s391_s5 = sshll.u32 (!%p390_p3), %s756_s30, 3  ;;  %s61_s6 = sld [smem:[#allocation6 + %s594_s4]] (!%p390_p3) }
  0x26   : > { %s602_s10 = scalar_lea.vmem (!%p390_p3), [#allocation8], %s391_s5 }
  0x2b   : > { %p62_p4 = scmp.lt.s32.totalorder %s61_s6, 18 }
  0x2d   : > { %s772_s6 = smov (!%p62_p4, %s61_s6), 18 }
  0x2e   : > { %s64_s9 = scalar_lea.vmem %s753_s2, %s772_s6 }
  0x2f   : > { %v97_v0 = vld [vmem:[%s64_s9] sm:$0xff]  ;;  %v99_v1 = vld [vmem:[%s64_s9 + $0x8] sm:$0xff] }
  0x30   : > { %98 = vst [vmem:[#allocation2] sm:$0xff] %v97_v0  ;;  %100 = vst [vmem:[#allocation2 + $0x8] sm:$0xff] %v99_v1 }
  0x31   : > { %108 = vsyncadd [#allocation4], 256  ;;  %v109_v2 = vlaneseq  ;;  %s605_s11 = sld [smem:[#allocation6 + %s594_s4]]  ;;  %s115_s12 = sadd.s32 1, %s594_s4 }
  0x32   : > { %s608_s13 = sld [smem:[#allocation6 + %s115_s12]]  ;;  %s118_s14 = sadd.s32 2, %s594_s4 }
  0x33   : > { %v611_v3 = vshrl.u32 %v109_v2, 7  ;;  %s613_s15 = sld [smem:[#allocation6 + %s118_s14]]  ;;  %s121_s16 = sadd.s32 3, %s594_s4 }
  0x34   : > { %s616_s17 = sld [smem:[#allocation6 + %s121_s16]]  ;;  %s622_s23 = sadd.s32 4, %s594_s4 }
  0x35   : > { %s619_s18 = sld [smem:[#allocation7 + %s594_s4]] }
  0x36   : > { %s125_s19 = sld [smem:[#allocation7 + %s115_s12]] }
  0x37   : > { %s126_s20 = sld [smem:[#allocation7 + %s118_s14]]  ;;  %p112_p5 = scmp.lt.s32.totalorder %s605_s11, 18 }
  0x38   : > { %s127_s0 = sld [smem:[#allocation7 + %s121_s16]] }
  0x39   : > { %s129_s25 = sld [smem:[#allocation6 + %s622_s23]] }
  0x3a   : > { %s627_s26 = scalar_select %p112_p5, %s605_s11, 18 }
  0x3c   : > { %s114_s5 = ssub.s32 %s605_s11, %s627_s26  ;;  %s117_s6 = ssub.s32 %s608_s13, %s627_s26 }
  0x3d   : > { %s120_s7 = ssub.s32 %s613_s15, %s627_s26  ;;  %s123_s8 = ssub.s32 %s616_s17, %s627_s26 }
  0x3f   : > { %p130_p6 = scmp.lt.s32.totalorder %s129_s25, 18 }
  0x41   : > { %s774_s25 = smov (!%p130_p6, %s129_s25), 18 }
  0x42   : > { %503 = dma.done.wait [#allocation4], 256 }
  0x43   : > { %504 = vsyncadd [#allocation4], 4294967040  ;;  %s135_s14 = scalar_lea.vmem %s753_s2, %s774_s25  ;;  %v190_v6 = vstv %s125_s19  ;;  %v197_v7 = vstv %s126_s20  ;;  %v204_v8 = vstv %s127_s0 }
  0x44   : > { %v169_v4 = vld [vmem:[%s135_s14] sm:$0xff]  ;;  %v171_v5 = vld [vmem:[%s135_s14 + $0x8] sm:$0xff] }
  0x45   : > { %170 = vst [vmem:[#allocation3] sm:$0xff] %v169_v4  ;;  %172 = vst [vmem:[#allocation3 + $0x8] sm:$0xff] %v171_v5 }
  0x46   : > { %180 = vsyncadd [#allocation4 + $0x1], 256  ;;  %s188_s13 = scalar_lea.vmem [#allocation2], %s117_s6  ;;  %vm191_vm0 = vcmp.lt.s32.totalorder %v611_v3, %v190_v6  ;;  %vm642_vm1 = vcmp.lt.s32.totalorder %v611_v3, %v197_v7  ;;  %vm205_vm2 = vcmp.lt.s32.totalorder %v611_v3, %v204_v8  ;;  %s195_s15 = scalar_lea.vmem [#allocation2], %s120_s7  ;;  %v183_v16 = vstv %s619_s18 }
  0x47   : > { %v189_v9 = vld [vmem:[%s188_s13] sm:$0xf]  ;;  %s758_s16 = smov 32   ;;  %s202_s17 = scalar_lea.vmem [#allocation2], %s123_s8  ;;  %vm184_vm3 = vcmp.lt.s32.totalorder %v611_v3, %v183_v16  ;;  %vm221_vm4 = vcmask 261120   ;;  %vm223_vm5 = vcmask 523264  }
  0x48   : > { %v194_v11 = vsel %vm191_vm0, %v189_v9, 0.0  ;;  %v196_v12 = vld [vmem:[%s195_s15] sm:$0xf]  ;;  %s649_s19 = sld [smem:[#allocation6 + %s622_s23]]  ;;  %s232_s20 = sadd.s32 5, %s594_s4  ;;  %vm225_vm6 = vcmask 785408  }
  0x49   : > { %210 = vrot.lane.b32.xlu0 %v194_v11, %s758_s16  ;;  %v203_v13 = vld [vmem:[%s202_s17] sm:$0xf]  ;;  %v201_v14 = vsel %vm642_vm1, %v196_v12, 0.0  ;;  %s235_s0 = sadd.s32 6, %s594_s4  ;;  %s757_s25 = smov 96  }
  0x4a   : > { %v208_v15 = vsel %vm205_vm2, %v203_v13, 0.0  ;;  %s656_s6 = sld [smem:[#allocation6 + %s232_s20]]  ;;  %s238_s8 = sadd.s32 7, %s594_s4 }
  0x4b   : > { %218 = vrot.lane.b32.xlu1 %v208_v15, %s757_s25  ;;  %s658_s7 = sld [smem:[#allocation6 + %s235_s0]]  ;;  %s759_s12 = smov 64  }
  0x4c   : > { %s662_s9 = sld [smem:[#allocation7 + %s622_s23]] }
  0x4d   : > { %214 = vrot.lane.b32.xlu0 %v201_v14, %s759_s12  ;;  %s665_s14 = sld [smem:[#allocation6 + %s238_s8]]  ;;  %s181_s12 = scalar_lea.vmem [#allocation2], %s114_s5 }
  0x4e   : > { %s242_s13 = sld [smem:[#allocation7 + %s232_s20]]  ;;  %p229_p7 = scmp.lt.s32.totalorder %s649_s19, 18  ;;  %v182_v17 = vld [vmem:[%s181_s12] sm:$0xf] }
  0x4f   : > { %s667_s15 = sld [smem:[#allocation7 + %s235_s0]]  ;;  %v187_v19 = vsel %vm184_vm3, %v182_v17, 0.0 }
  0x50   : > { %s244_s17 = sld [smem:[#allocation7 + %s238_s8]] }
  0x51   : > { %s671_s30 = scalar_select %p229_p7, %s649_s19, 18 }
  0x53   : > { %s231_s4 = ssub.s32 %s649_s19, %s671_s30  ;;  %s234_s23 = ssub.s32 %s656_s6, %s671_s30 }
  0x54   : > { %s237_s25 = ssub.s32 %s658_s7, %s671_s30  ;;  %s240_s16 = ssub.s32 %s665_s14, %s671_s30 }
  0xbb   : > { %v211_v18 = vpop.permute.xlu0 %210 }
  0xbc   : > { %v222_v21 = vsel %vm221_vm4, %v187_v19, %v211_v18 }
  0xbd   : > { %v219_v20 = vpop.permute.xlu1 %218 }
  0xbf   : > { %v215_v22 = vpop.permute.xlu0 %214 }
  0xc0   : > { %v224_v23 = vsel %vm223_vm5, %v222_v21, %v215_v22 }
  0xc1   : > { %v226_v24 = vsel %vm225_vm6, %v224_v23, %v219_v20 }
  0xc2   : > { %227 = vst [vmem:[%s602_s10] sm:$0xf] %v226_v24 }
  0xc3   : > { %505 = dma.done.wait [#allocation4 + $0x1], 256 }
  0xc4   : > { %506 = vsyncadd [#allocation4 + $0x1], 4294967040  ;;  %v256_v25 = vstv %s242_s13  ;;  %v270_v26 = vstv %s244_s17  ;;  %v263_v27 = vstv %s667_s15  ;;  %s254_s11 = scalar_lea.vmem [#allocation3], %s234_s23  ;;  %s261_s18 = scalar_lea.vmem [#allocation3], %s237_s25  ;;  %v249_v34 = vstv %s662_s9 }
  0xc5   : > { %vm257_vm7 = vcmp.lt.s32.totalorder %v611_v3, %v256_v25  ;;  %vm271_vm8 = vcmp.lt.s32.totalorder %v611_v3, %v270_v26  ;;  %v255_v28 = vld [vmem:[%s254_s11] sm:$0xf]  ;;  %vm264_vm9 = vcmp.lt.s32.totalorder %v611_v3, %v263_v27  ;;  %s268_s26 = scalar_lea.vmem [#allocation3], %s240_s16  ;;  %s764_s5 = smov 32   ;;  %vm250_vm10 = vcmp.lt.s32.totalorder %v611_v3, %v249_v34 }
  0xc6   : > { %v262_v29 = vld [vmem:[%s261_s18] sm:$0xf]  ;;  %v260_v31 = vsel %vm257_vm7, %v255_v28, 0.0  ;;  %s765_s20 = smov 96   ;;  %s766_s0 = smov 64  }
  0xc7   : > { %v269_v30 = vld [vmem:[%s268_s26] sm:$0xf]  ;;  %276 = vrot.lane.b32.xlu0 %v260_v31, %s764_s5  ;;  %v267_v33 = vsel %vm264_vm9, %v262_v29, 0.0  ;;  %s247_s25 = scalar_lea.vmem [#allocation3], %s231_s4  ;;  %s400_s16 = sshll.u32 %s521_s22, 7 }
  0xc8   : > { %v274_v32 = vsel %vm271_vm8, %v269_v30, 0.0  ;;  %v248_v35 = vld [vmem:[%s247_s25] sm:$0xf]  ;;  %s306_s6 = sshll.u32 %s602_s10, 4  ;;  %s709_s9 = scalar_lea.hbm %s754_s3, %s400_s16  ;;  %s711_s6 = int_to_ptr.vmem [resolvable:$true] %s306_s6 }
  0xc9   : > { %284 = vrot.lane.b32.xlu1 %v274_v32, %s765_s20  ;;  %v253_v37 = vsel %vm250_vm10, %v248_v35, 0.0  ;;  %s767_s30 = sand.u32 1, %s517_s21   ;;  %s461_s12 = scalar_lea.vmem %s711_s6, 128 }
  0xca   : > { %s292_s19 = scalar_lea.sflag [#allocation9], %s767_s30  ;;  %p462_p8 = scmp.ne.s32.totalorder %s711_s6, %s461_s12 }
  0xcb   : > { %280 = vrot.lane.b32.xlu0 %v267_v33, %s766_s0  ;;  %s528_s14 = smov [#allocation8]  }
  0xcc   : > { %p463_p9 = pnand %p462_p8, %p583_p0  ;;  %s465_s13 = sshll.u32 %s528_s14, 4  ;;  %s466_s13 = int_to_ptr.vmem [resolvable:$false] %s465_s13 }
  0xcd   : > { %s467_s15 = scalar_lea.vmem %s466_s13, 256  ;;  %p468_p11 = scmp.lt.s32.totalorder %s711_s6, %s466_s13 }
  0xce   : > { %p464_p10 = pneg %p463_p9  ;;  %p469_p12 = scmp.lt.s32.totalorder %s467_s15, %s461_s12 }
  0xd0   : > { %p470_p13 = por %p469_p12, %p468_p11 }
  0xd2   : > { %p471_p1 = pnand %p470_p13, %p464_p10 }
 0x139   : > { %v277_v36 = vpop.permute.xlu0 %276 }
 0x13a   : > { %v287_v39 = vsel %vm221_vm4, %v253_v37, %v277_v36 }
 0x13b   : > { %v285_v38 = vpop.permute.xlu1 %284 }
 0x13d   : > { %v281_v40 = vpop.permute.xlu0 %280 }
 0x13e   : > { %v288_v41 = vsel %vm223_vm5, %v287_v39, %v281_v40 }
 0x13f   : > { %v289_v42 = vsel %vm225_vm6, %v288_v41, %v285_v38 }
 0x140   : > { %290 = vst [vmem:[%s602_s10 + $0x4] sm:$0xf] %v289_v42 }
 0x141   : > { %474 = shalt.err (!%p471_p1)
}
 0x142   : > { %s475_s10 = scalar_lea.hbm %s709_s9, 128  ;;  %s479_s23 = scalar_lea.hbm %s754_s3, 256 }
 0x143   : > { %p476_p3 = scmp.ne.s32.totalorder %s709_s9, %s475_s10  ;;  %p480_p6 = scmp.lt.u32.totalorder %s709_s9, %s754_s3 }
 0x144   : > { %p481_p7 = scmp.lt.u32.totalorder %s479_s23, %s475_s10  ;;  %p483_p9 = scmp.lt.u32.totalorder %s475_s10, %s709_s9 }
 0x145   : > { %p477_p4 = pnand %p476_p3, %p583_p0 }
 0x146   : > { %p482_p8 = por %p481_p7, %p480_p6 }
 0x147   : > { %p478_p5 = pneg %p477_p4 }
 0x148   : > { %p484_p10 = por %p483_p9, %p482_p8 }
 0x14a   : > { %p485_p11 = pnand %p484_p10, %p478_p5 }
 0x14c   : > { %488 = shalt.err (!%p485_p11)
}
 0x14d   : > { %401 = dma.vmem_to_hbm [thread:$0]  (%p583_p0), %s711_s6, 128, %s709_s9, %s292_s19  }
 0x14e PF: > { %p407_p12 = scmp.ge.s32.totalorder %s521_s22, 1  ;;  %s318_s26 = sand.u32 1, %s513_s1  }
 0x14f   : > { %s319_s5 = scalar_lea.sflag [#allocation9], %s318_s26 }
 0x150   : > { %p404_p13 = pnand %p407_p12, %p587_p2 }
 0x152   : > { %508 = dma.done.wait (!%p404_p13), %s319_s5, 128  }
 0x153   : > { %510 = vsyncadd (!%p404_p13), %s319_s5, 4294967168  ;;  %p23_p1 = scmp.ge.s32.totalorder %s572_s24, 3   ;;  %s768_s1 = smov %s517_s21 }
 0x154   : > { %s769_s21 = smov %s581_s27  ;;  %s770_s22 = smov %s572_s24 }
 0x155   :  { %25 = sbr.rel (!%p23_p1) target bundleno = 28 (0x1c), region = 140 }
 0x15c   :  { %324 = vsyncpa [#allocation9], 1 }
 0x15d   :  { %326 = vsyncpa [#allocation9 + $0x1], 1 }
 0x15e   :  { %327 = vsyncmov [#allocation4] }
 0x161   :  { %s328_s22 = vpop.sfrf %327 }
 0x162   :  { %p398_p0 = scmp.ne.s32.totalorder %s328_s22, 0 }
 0x164   :  { %332 = shalt.err (%p398_p0)  }
 0x165   :  { %334 = vsyncmov [#allocation4 + $0x1] }
 0x168   :  { %s335_s28 = vpop.sfrf %334 }
 0x169   :  { %p399_p2 = scmp.ne.s32.totalorder %s335_s28, 0 }
 0x16b   :  { %339 = shalt.err (%p399_p2)  }

</bundles_post_ra>
